<compile_context>
chip_gen: v6e
topology: v6e:2x2x1
jax: 0.10.0
libtpu: 0.0.40
codegen_flags: <defaults>
</compile_context>

<pallas_src>
import functools
import math

import jax
import jax.numpy as jnp
from jax.experimental import pallas as pl
from jax.experimental.pallas import tpu as pltpu


# --------------------------------------------------------------------------
# Kernel body
# --------------------------------------------------------------------------
def _maxout_kernel(x_ref, o_ref, *, pool_size, use_strided):
    # x_ref: (tm, W), o_ref: (tm, W // pool_size); W is a multiple of pool_size.
    x = x_ref[...]
    rows, w = x.shape
    if pool_size == 1:
        o_ref[...] = x
        return
    if use_strided:
        # Roll-and-max tree: after ceil(log2(p)) steps, lane j holds
        # max(x[j : j + p]) for every group-aligned lane (j % p == 0).
        # Group windows never cross a block boundary (W % p == 0), so the
        # wrap-around lanes are never selected.
        acc = x
        covered = 1
        while covered < pool_size:
            shift = min(covered, pool_size - covered)
            acc = jnp.maximum(acc, pltpu.roll(acc, shift=w - shift, axis=-1))
            covered += shift
        # Single stride-p lane compaction -> lane-dense output block.
        o_ref[...] = acc[:, ::pool_size]
    else:
        # Fallback: pool-minor reshape + reduce (always lowers; more relayout).
        o_ref[...] = jnp.max(x.reshape(rows, w // pool_size, pool_size), axis=-1)


@functools.lru_cache(maxsize=None)
def _lane_strided_ok():
    """Probe: does the stride-p lane compaction lower (and compute correctly)?"""
    try:
        with jax.ensure_compile_time_eval():
            kern = functools.partial(_maxout_kernel, pool_size=4, use_strided=True)
            x = jnp.arange(8 * 512, dtype=jnp.float32).reshape(8, 512)
            out = pl.pallas_call(
                kern, out_shape=jax.ShapeDtypeStruct((8, 128), jnp.float32))(x)
            jax.block_until_ready(out)
            ref = jnp.max(x.reshape(8, 128, 4), axis=-1)
            return bool(jnp.array_equal(out, ref))
    except Exception:
        return False  # unsupported lowering -> reshape fallback


# --------------------------------------------------------------------------
# Tiling heuristics (generation-aware)
# --------------------------------------------------------------------------
def _vmem_capacity_bytes():
    try:
        return int(pltpu.get_tpu_info().vmem_capacity_bytes)
    except Exception:
        return 64 * 1024 * 1024  # conservative default (v7x-sized VMEM)


def _pick_tiles(rows_f, h_f, pool_size, itemsize, row_tile):
    """Pick (tm, th): row / lane block sizes, VMEM-budgeted and layout-aligned."""
    vmem_cap = _vmem_capacity_bytes()
    # Block budget: ~vmem/3 (double-buffered in+out must fit with slack):
    # ~42 MiB on 128 MiB v5e/v6e, ~21 MiB on 64 MiB v7x.
    budget = max(8 << 20, min(48 << 20, vmem_cap // 3))
    # The 64 MiB-VMEM part (v7x) has 2 TensorCores -> want >= 8 parallel grid
    # steps; single-TC v5e/v6e prefer fewer, bigger blocks.
    min_steps = 8 if vmem_cap <= (64 << 20) else 4

    sub = max(8, 32 // itemsize)          # sublane quantum: 8 f32 / 16 bf16 / 32 i8
    lane_q = pool_size * 128              # H-block quantum: group-aligned, lane-dense out

    def block_bytes(tm, th):
        # double-buffered input + output blocks
        return 2 * tm * (th + th // pool_size) * itemsize

    # Split H only when even a minimal (sub-row) block over the full width
    # would blow the budget -> bounds VMEM independently of H (v7x-safe).
    th = h_f
    if block_bytes(sub, h_f) > budget and h_f > lane_q:
        per_lane = 2.0 * sub * (1.0 + 1.0 / pool_size) * itemsize
        th = int(budget / per_lane)
        th = max(lane_q, (th // lane_q) * lane_q)

    # Row tile under the budget for the chosen th.
    if row_tile is not None:
        tm = max(sub, (row_tile // sub) * sub)
    else:
        tm = max(sub, (budget // block_bytes(1, th)) // sub * sub)
        # Keep enough grid steps to feed all TensorCores when rows allow it.
        if th == h_f and rows_f >= min_steps * sub:
            tm = min(tm, max(sub, (pl.cdiv(rows_f, min_steps) // sub) * sub))
    tm = min(tm, rows_f)
    return tm, th, vmem_cap


# --------------------------------------------------------------------------
# Public wrapper
# --------------------------------------------------------------------------
def maxout(x, pool_size, *, row_tile=None):
    """Pallas MaxOut over the last dim of `x` (out[..., i] = max of group i)."""
    orig_shape = x.shape
    h = orig_shape[-1]
    assert h % pool_size == 0, "last dim must be divisible by pool_size"
    out_h = h // pool_size
    lead = orig_shape[:-1]
    rows = math.prod(lead)

    if pool_size == 1:
        return x
    if rows == 0 or h == 0:
        return jnp.zeros((*lead, out_h), x.dtype)

    itemsize = jnp.dtype(x.dtype).itemsize
    x2d = x.reshape(rows, h)

    # Lane fold: pack g consecutive rows into one super-row so the *output*
    # last dim (g * out_h) is >= 128 lanes (dense, unmasked stores).  Rows are
    # padded up to a multiple of g; pad rows are sliced away after the kernel.
    if out_h >= 128:
        g, rows_pad = 1, rows
    else:
        g = -(-128 // out_h)
        rows_pad = -(-rows // g) * g
        if rows_pad != rows:
            x2d = jnp.pad(x2d, ((0, rows_pad - rows), (0, 0)))
    rows_f = rows_pad // g
    h_f, out_f = g * h, g * out_h
    x2d = x2d.reshape(rows_f, h_f)

    tm, th, vmem_cap = _pick_tiles(rows_f, h_f, pool_size, itemsize, row_tile)
    grid = (pl.cdiv(rows_f, tm), pl.cdiv(h_f, th))

    needed = 2 * tm * (th + th // pool_size) * itemsize
    vmem_limit = int(min(0.9 * vmem_cap, max(32 << 20, 1.3 * needed)))
    vmem_limit = max(vmem_limit, needed + (1 << 20))

    kernel = functools.partial(
        _maxout_kernel, pool_size=pool_size, use_strided=_lane_strided_ok())
    cost = pl.CostEstimate(
        flops=rows * (h - out_h),                      # number of compares
        transcendentals=0,
        bytes_accessed=(rows * h + rows * out_h) * itemsize,
    )

    out2d = pl.pallas_call(
        kernel,
        out_shape=jax.ShapeDtypeStruct((rows_f, out_f), x.dtype),
        grid=grid,
        in_specs=[pl.BlockSpec((tm, th), lambda i, j: (i, j))],
        out_specs=pl.BlockSpec((tm, th // pool_size), lambda i, j: (i, j)),
        compiler_params=pltpu.CompilerParams(
            dimension_semantics=("parallel", "parallel"),
            vmem_limit_bytes=vmem_limit,
        ),
        cost_estimate=cost,
    )(x2d)

    out = out2d.reshape(rows_pad, out_h)[:rows]
    return out.reshape(*lead, out_h)


def maxout_ref(x, pool_size):
    """Pure-JAX reference (mirrors the PyTorch forward exactly)."""
    h = x.shape[-1]
    grouped = x.reshape(*x.shape[:-1], h // pool_size, pool_size)
    return jnp.max(grouped, axis=-1)


if __name__ == "__main__":
    key = jax.random.PRNGKey(0)
    batch, seq, hidden = 2, 8, 32
    pool_size = 4

    # Primary shape consistent with the module: (2, 8, 32), pool=4 -> (2, 8, 8).
    x = jax.random.normal(key, (batch, seq, hidden), dtype=jnp.float32)
    out = jax.block_until_ready(maxout(x, pool_size))
    ref = maxout_ref(x, pool_size)
    assert out.shape == (batch, seq, hidden // pool_size)
    assert jnp.allclose(out, ref), "Pallas MaxOut mismatch vs reference"

    # Multi-step (pipelined) row grid with a forced small tile.
    x2 = jax.random.normal(jax.random.PRNGKey(1), (32, 8, 32), dtype=jnp.float32)
    out2 = jax.block_until_ready(maxout(x2, 4, row_tile=8))
    assert jnp.allclose(out2, maxout_ref(x2, 4)), "mismatch on multi-step grid"

    # Ragged (cdiv) last row block + row-padding path (rows not a fold multiple).
    x3 = jax.random.normal(jax.random.PRNGKey(2), (25, 7, 32), dtype=jnp.float32)
    out3 = jax.block_until_ready(maxout(x3, 4, row_tile=8))
    assert jnp.allclose(out3, maxout_ref(x3, 4)), "mismatch on ragged/padded grid"

    # Lane-dense (out_h >= 128, no fold) path with an auto-chosen multi-step grid.
    x4 = jax.random.normal(jax.random.PRNGKey(3), (4, 64, 512), dtype=jnp.float32)
    out4 = jax.block_until_ready(maxout(x4, 4))
    assert jnp.allclose(out4, maxout_ref(x4, 4)), "mismatch on wide-H path"

    print("KERNEL_OK")
</pallas_src>

<mosaic_0001>
module attributes {stable_mosaic.version = 11 : i64} {
  func.func @_maxout_kernel(%arg0: i32, %arg1: i32, %arg2: memref<1x512xf32, #tpu.memory_space<vmem>>, %arg3: memref<1x128xf32, #tpu.memory_space<vmem>>) attributes {dimension_semantics = [#tpu.dimension_semantics<parallel>, #tpu.dimension_semantics<parallel>], iteration_bounds = array<i64: 1, 1>, scalar_prefetch = 0 : i64, scratch_operands = 0 : i64, tpu.core_type = #tpu.core_type<tc>, window_params = [{transform_indices = @transform_0, window_bounds = array<i64: 1, 512>}, {transform_indices = @transform_1, window_bounds = array<i64: 1, 128>}]} {
    %c0 = arith.constant 0 : index
    %c0_0 = arith.constant 0 : index
    %0 = vector.load %arg2[%c0, %c0_0] : memref<1x512xf32, #tpu.memory_space<vmem>>, vector<1x512xf32>
    %1 = vector.shape_cast %0 : vector<1x512xf32> to vector<1x128x4xf32>
    %cst = arith.constant dense<0xFF800000> : vector<1x128xf32>
    %2 = vector.multi_reduction <maximumf>, %1, %cst [2] : vector<1x128x4xf32> to vector<1x128xf32>
    %c0_1 = arith.constant 0 : index
    %c0_2 = arith.constant 0 : index
    %3 = vector.load %arg3[%c0_1, %c0_2] : memref<1x128xf32, #tpu.memory_space<vmem>>, vector<1x128xf32>
    tpu.vector_store %arg3[%c0_1, %c0_2], %2 {strides = array<i32>} : memref<1x128xf32, #tpu.memory_space<vmem>>, vector<1x128xf32>,
    return
  }
  func.func @transform_0(%arg0: i32, %arg1: i32) -> (i32, i32) {
    %c0_i32 = arith.constant 0 : i32
    return %arg0, %arg1 : i32, i32
  }
  func.func @transform_1(%arg0: i32, %arg1: i32) -> (i32, i32) {
    %c0_i32 = arith.constant 0 : i32
    return %arg0, %arg1 : i32, i32
  }
}

</mosaic_0001>

<bundles_post_ra>
// kernel: tpu_custom_call.1
= control target key start
LH: loop header
LB: loop body
LE: loop exit
PB: predicated region body
PF: predicated region fallthrough
CT: control target
= control target key end

     0   :  { %6 = vsyncpa [#allocation3], 0  ;;  %s1641_s0 = inlined_call_operand.hbm [shape: f32[1,512], index: 0, kind: input, shape index: {}]   ;;  %s1642_s1 = inlined_call_operand.hbm [shape: f32[1,128], index: 1, kind: output, shape index: {}]  }
   0x1   :  { %7 = vsyncpa [#allocation4], 0  ;;  %s1252_s6 = smov [#allocation2]  }
   0x2   :  { %s14_s7 = sshll.u32 %s1252_s6, 4  ;;  %s15_s7 = int_to_ptr.vmem [resolvable:$true] %s14_s7 }
   0x3   :  { %s1216_s8 = scalar_lea.vmem %s15_s7, 64  ;;  %p1221_p1 = scmp.lt.s32.totalorder %s15_s7, %s15_s7 }
   0x4   :  { %p1217_p0 = scmp.ne.s32.totalorder %s15_s7, %s1216_s8  ;;  %p1222_p2 = scmp.lt.s32.totalorder %s1216_s8, %s1216_s8 }
   0x6   :  { %p1223_p3 = por %p1222_p2, %p1221_p1 }
   0x8   :  { %p1224_p4 = pnand %p1223_p3, %p1217_p0 }
   0xa   :  { %1227 = shalt.err (!%p1224_p4)
}
   0xb   :  { %17 = dma.hbm_to_vmem [thread:$0]  %s1641_s0, 64, %s15_s7, [#allocation3]  }
   0xc   :  { %1248 = dma.done.wait [#allocation3], 64  }
   0xd   :  { %1249 = vsyncadd [#allocation3], 4294967232  ;;  %v1299_v0 = vld [vmem:[#allocation2] sm:$0xf]  ;;  %s1253_s11 = smov 124   ;;  %s1254_s12 = smov 116   ;;  %v1643_v3 = vlaneseq }
   0xe   :  { %24 = vrot.lane.b32.xlu0 %v1299_v0, %s1253_s11  ;;  %30 = vrot.lane.b32.xlu1 %v1299_v0, %s1254_s12  ;;  %s1255_s13 = smov 120   ;;  %s1256_s14 = smov 112   ;;  %v1284_v1 = vmov 1966171168   ;;  %v23_v8 = vrot.slane %v1299_v0, 1  ;;  %v117_v10 = vrot.slane %v1299_v0, 2 }
   0xf   :  { %s1257_s15 = smov 108   ;;  %s1258_s0 = smov 104   ;;  %v186_v2 = vunpack.c.l.s4 %v1284_v1  ;;  %v1333_v7 = vshrl.u32 %v1643_v3, 7  ;;  %v149_v12 = vrot.slane %v1299_v0, 3  ;;  %vm981_vm0 = vcmask 31744  }
  0x10   :  { %s1259_s16 = smov 100   ;;  %s1260_s17 = smov 96   ;;  %vm1057_vm1 = vcmask 130112   ;;  %vm1064_vm2 = vcmask 195712   ;;  %vm1071_vm3 = vcmask 261312   ;;  %vm1078_vm4 = vcmask 326912  }
  0x11   :  { %s1261_s18 = smov 92   ;;  %s1262_s19 = smov 88   ;;  %v187_v6 = vunpack.c.0.s8 %v186_v2  ;;  %vm1085_vm5 = vcmask 392512   ;;  %vm1092_vm6 = vcmask 458112   ;;  %vm1099_vm7 = vcmask 523712  }
  0x12   :  { %27 = vrot.lane.b32.xlu0 %v1299_v0, %s1255_s13  ;;  %33 = vrot.lane.b32.xlu1 %v1299_v0, %s1256_s14  ;;  %s1263_s20 = smov 84   ;;  %s1264_s21 = smov 80   ;;  %vm1106_vm8 = vcmask 589312   ;;  %vm1113_vm9 = vcmask 654912   ;;  %vm1120_vm10 = vcmask 720512   ;;  %vm1127_vm11 = vcmask 786112  }
  0x13   :  { %s1265_s22 = smov 76   ;;  %s1266_s23 = smov 72   ;;  %v1339_v16 = vsub.s32 %v187_v6, %v1333_v7  ;;  %vm1134_vm12 = vcmask 851712   ;;  %vm1141_vm13 = vcmask 917312   ;;  %vm1148_vm14 = vcmask 982912  }
  0x14   :  { %s1267_s24 = smov 68   ;;  %s1268_s25 = smov 64   ;;  %vm1155_vm15 = vcmask 1048512  }
  0x15   :  { %s1269_s26 = smov 60   ;;  %s1270_s27 = smov 56  }
  0x16   :  { %36 = vrot.lane.b32.xlu0 %v1299_v0, %s1257_s15  ;;  %39 = vrot.lane.b32.xlu1 %v1299_v0, %s1258_s0  ;;  %s1271_s28 = smov 52   ;;  %s1272_s29 = smov 48  }
  0x17   :  { %s1273_s30 = smov 44   ;;  %s1274_s2 = smov 40  }
  0x18   :  { %s1275_s3 = smov 36   ;;  %s1276_s4 = smov 32  }
  0x19   :  { %s1277_s5 = smov 28   ;;  %s1278_s6 = smov 24  }
  0x1a   :  { %42 = vrot.lane.b32.xlu0 %v1299_v0, %s1259_s16  ;;  %45 = vrot.lane.b32.xlu1 %v1299_v0, %s1260_s17  ;;  %s1279_s7 = smov 20   ;;  %s1280_s8 = smov 16  }
  0x1b   :  { %s1281_s9 = smov 12   ;;  %s1282_s10 = smov 8  }
  0x1c   :  { %s1283_s11 = smov 4   ;;  %s1285_s12 = smov [#allocation5]  }
  0x1d   :  { %s1165_s13 = sshll.u32 %s1285_s12, 4  ;;  %s1166_s13 = int_to_ptr.vmem [resolvable:$true] %s1165_s13 }
  0x1e   :  { %48 = vrot.lane.b32.xlu0 %v1299_v0, %s1261_s18  ;;  %51 = vrot.lane.b32.xlu1 %v1299_v0, %s1262_s19  ;;  %s1228_s14 = scalar_lea.vmem %s1166_s13, 16  ;;  %s1232_s15 = scalar_lea.vmem %s1166_s13, 32 }
  0x1f   :  { %p1229_p5 = scmp.ne.s32.totalorder %s1166_s13, %s1228_s14  ;;  %p1233_p6 = scmp.lt.s32.totalorder %s1166_s13, %s1166_s13 }
  0x20   :  { %p1234_p7 = scmp.lt.s32.totalorder %s1232_s15, %s1228_s14 }
  0x22   :  { %54 = vrot.lane.b32.xlu0 %v1299_v0, %s1263_s20  ;;  %57 = vrot.lane.b32.xlu1 %v1299_v0, %s1264_s21  ;;  %p1235_p8 = por %p1234_p7, %p1233_p6 }
  0x24   :  { %p1236_p9 = pnand %p1235_p8, %p1229_p5 }
  0x26   :  { %60 = vrot.lane.b32.xlu0 %v1299_v0, %s1265_s22  ;;  %63 = vrot.lane.b32.xlu1 %v1299_v0, %s1266_s23 }
  0x2a   :  { %66 = vrot.lane.b32.xlu0 %v1299_v0, %s1267_s24  ;;  %69 = vrot.lane.b32.xlu1 %v1299_v0, %s1268_s25 }
  0x2e   :  { %72 = vrot.lane.b32.xlu0 %v1299_v0, %s1269_s26  ;;  %75 = vrot.lane.b32.xlu1 %v1299_v0, %s1270_s27 }
  0x32   :  { %78 = vrot.lane.b32.xlu0 %v1299_v0, %s1271_s28  ;;  %81 = vrot.lane.b32.xlu1 %v1299_v0, %s1272_s29 }
  0x36   :  { %84 = vrot.lane.b32.xlu0 %v1299_v0, %s1273_s30  ;;  %87 = vrot.lane.b32.xlu1 %v1299_v0, %s1274_s2 }
  0x3a   :  { %90 = vrot.lane.b32.xlu0 %v1299_v0, %s1275_s3  ;;  %93 = vrot.lane.b32.xlu1 %v1299_v0, %s1276_s4 }
  0x3e   :  { %96 = vrot.lane.b32.xlu0 %v1299_v0, %s1277_s5  ;;  %99 = vrot.lane.b32.xlu1 %v1299_v0, %s1278_s6 }
  0x42   :  { %102 = vrot.lane.b32.xlu0 %v1299_v0, %s1279_s7  ;;  %105 = vrot.lane.b32.xlu1 %v1299_v0, %s1280_s8 }
  0x46   :  { %108 = vrot.lane.b32.xlu0 %v1299_v0, %s1281_s9  ;;  %111 = vrot.lane.b32.xlu1 %v1299_v0, %s1282_s10 }
  0x4a   :  { %114 = vrot.lane.b32.xlu0 %v1299_v0, %s1283_s11 }
  0x80   :  { %v25_v4 = vpop.permute.xlu0 %24  ;;  %v31_v5 = vpop.permute.xlu1 %30 }
  0x81   :  { %v26_v9 = vrot.slane %v25_v4, 1  ;;  %v118_v11 = vrot.slane %v25_v4, 2  ;;  %v150_v13 = vrot.slane %v25_v4, 3  ;;  %v181_v17 = vcombine.low %v1299_v0, %v25_v4 }
  0x82   :  { %v32_v20 = vrot.slane %v31_v5, 1  ;;  %v120_v21 = vrot.slane %v31_v5, 2  ;;  %v152_v24 = vrot.slane %v31_v5, 3 }
  0x83   :  { %v377_v19 = vcombine.low %v23_v8, %v26_v9  ;;  %v573_v23 = vcombine.low %v117_v10, %v118_v11  ;;  %v1342_v27 = vcombine.low %v149_v12, %v150_v13  ;;  %v191_v31 = vrot.slane %v181_v17, %v1339_v16 }
  0x84   :  { %v28_v14 = vpop.permute.xlu0 %27  ;;  %v34_v15 = vpop.permute.xlu1 %33 }
  0x85   :  { %v182_v18 = vcombine.low %v28_v14, %v31_v5  ;;  %v29_v22 = vrot.slane %v28_v14, 1  ;;  %v119_v25 = vrot.slane %v28_v14, 2  ;;  %v151_v26 = vrot.slane %v28_v14, 3 }
  0x86   :  { %v35_v32 = vrot.slane %v34_v15, 1  ;;  %v121_v33 = vrot.slane %v34_v15, 2  ;;  %v153_v36 = vrot.slane %v34_v15, 3  ;;  %v387_v38 = vrot.slane %v377_v19, %v1339_v16 }
  0x87   :  { %v198_v28 = vrot.slane %v182_v18, %v1339_v16  ;;  %v378_v35 = vcombine.low %v29_v22, %v32_v20  ;;  %v574_v39 = vcombine.low %v119_v25, %v120_v21  ;;  %v1347_v40 = vcombine.low %v151_v26, %v152_v24 }
  0x88   :  { %v37_v29 = vpop.permute.xlu0 %36  ;;  %v40_v30 = vpop.permute.xlu1 %39  ;;  %v583_v42 = vrot.slane %v573_v23, %v1339_v16  ;;  %v779_v48 = vrot.slane %v1342_v27, %v1339_v16 }
  0x89   :  { %v38_v34 = vrot.slane %v37_v29, 1  ;;  %v183_v37 = vcombine.low %v34_v15, %v37_v29  ;;  %v122_v41 = vrot.slane %v37_v29, 2  ;;  %v154_v43 = vrot.slane %v37_v29, 3 }
  0x8a   :  { %v41_v44 = vrot.slane %v40_v30, 1  ;;  %v213_v47 = vcombine.low %v191_v31, %v198_v28  ;;  %v123_v50 = vrot.slane %v40_v30, 2  ;;  %v155_v54 = vrot.slane %v40_v30, 3 }
  0x8b   :  { %v379_v49 = vcombine.low %v35_v32, %v38_v34  ;;  %v205_v53 = vrot.slane %v183_v37, %v1339_v16  ;;  %v575_v57 = vcombine.low %v121_v33, %v122_v41  ;;  %v394_v59 = vrot.slane %v378_v35, %v1339_v16 }
  0x8c   :  { %v43_v45 = vpop.permute.xlu0 %42  ;;  %v46_v46 = vpop.permute.xlu1 %45  ;;  %v590_v60 = vrot.slane %v574_v39, %v1339_v16  ;;  %v1356_v61 = vcombine.low %v153_v36, %v154_v43  ;;  %v221_v1 = vrot.slane %v213_v47, %v1339_v16  ;;  %v786_v2 = vrot.slane %v1347_v40, %v1339_v16 }
  0x8d   :  { %v44_v51 = vrot.slane %v43_v45, 1  ;;  %v184_v52 = vcombine.low %v40_v30, %v43_v45  ;;  %v124_v55 = vrot.slane %v43_v45, 2  ;;  %v156_v56 = vrot.slane %v43_v45, 3 }
  0x8e   :  { %v47_v4 = vrot.slane %v46_v46, 1  ;;  %v125_v5 = vrot.slane %v46_v46, 2  ;;  %v157_v6 = vrot.slane %v46_v46, 3  ;;  %v401_v8 = vrot.slane %v379_v49, %v1339_v16 }
  0x8f   :  { %v212_v58 = vrot.slane %v184_v52, %v1339_v16  ;;  %v380_v62 = vcombine.low %v41_v44, %v44_v51  ;;  %v576_v9 = vcombine.low %v123_v50, %v124_v55  ;;  %v1362_v10 = vcombine.low %v155_v54, %v156_v56 }
  0x90   :  { %v49_v63 = vpop.permute.xlu0 %48  ;;  %v52_v0 = vpop.permute.xlu1 %51  ;;  %v409_v14 = vcombine.low %v387_v38, %v394_v59  ;;  %v597_v15 = vrot.slane %v575_v57, %v1339_v16  ;;  %v1365_v17 = vcombine.low %v583_v42, %v590_v60  ;;  %v793_v23 = vrot.slane %v1356_v61, %v1339_v16 }
  0x91   :  { %v230_v11 = vcombine.low %v46_v46, %v49_v63  ;;  %v214_v12 = vcombine.low %v205_v53, %v212_v58  ;;  %v50_v13 = vrot.slane %v49_v63, 1  ;;  %v126_v18 = vrot.slane %v49_v63, 2 }
  0x92   :  { %v408_v22 = vrot.slane %v380_v62, %v1339_v16  ;;  %v158_v24 = vrot.slane %v49_v63, 3  ;;  %v53_v25 = vrot.slane %v52_v0, 1  ;;  %v127_v26 = vrot.slane %v52_v0, 2 }
  0x93   :  { %v228_v21 = vrot.slane %v214_v12, %v1339_v16  ;;  %v240_v29 = vrot.slane %v230_v11, %v1339_v16  ;;  %v159_v30 = vrot.slane %v52_v0, 3  ;;  %v1372_v33 = vcombine.low %v47_v4, %v50_v13 }
  0x94   :  { %v55_v19 = vpop.permute.xlu0 %54  ;;  %v58_v20 = vpop.permute.xlu1 %57  ;;  %v604_v36 = vrot.slane %v576_v9, %v1339_v16  ;;  %v1375_v37 = vcombine.low %v125_v5, %v126_v18  ;;  %v410_v43 = vcombine.low %v401_v8, %v408_v22  ;;  %v1379_v44 = vcombine.low %v157_v6, %v158_v24 }
  0x95   :  { %v231_v28 = vcombine.low %v52_v0, %v55_v19  ;;  %v56_v31 = vrot.slane %v55_v19, 1  ;;  %v229_v32 = vcombine.low %v221_v1, %v228_v21  ;;  %v128_v34 = vrot.slane %v55_v19, 2 }
  0x96   :  { %v160_v35 = vrot.slane %v55_v19, 3  ;;  %v59_v45 = vrot.slane %v58_v20, 1  ;;  %v129_v46 = vrot.slane %v58_v20, 2  ;;  %v417_v47 = vrot.slane %v409_v14, %v1339_v16 }
  0x97   :  { %v247_v38 = vrot.slane %v231_v28, %v1339_v16  ;;  %v982_v39 = vsel %vm981_vm0, %v229_v32, -inf  ;;  %v1382_v49 = vcombine.low %v53_v25, %v56_v31  ;;  %v161_v50 = vrot.slane %v58_v20, 3 }
  0x98   :  { %v61_v41 = vpop.permute.xlu0 %60  ;;  %v64_v42 = vpop.permute.xlu1 %63  ;;  %983 = vmax.xlane.f32.xlu1 %v982_v39  ;;  %v1384_v53 = vcombine.low %v127_v26, %v128_v34  ;;  %v1386_v54 = vcombine.low %v159_v30, %v160_v35  ;;  %v606_v56 = vcombine.low %v597_v15, %v604_v36  ;;  %v424_v62 = vrot.slane %v410_v43, %v1339_v16 }
  0x99   :  { %v62_v51 = vrot.slane %v61_v41, 1  ;;  %v232_v52 = vcombine.low %v58_v20, %v61_v41  ;;  %v130_v55 = vrot.slane %v61_v41, 2  ;;  %v162_v57 = vrot.slane %v61_v41, 3 }
  0x9a   :  { %v262_v60 = vcombine.low %v240_v29, %v247_v38  ;;  %v613_v63 = vrot.slane %v1365_v17, %v1339_v16  ;;  %v65_v0 = vrot.slane %v64_v42, 1  ;;  %v131_v1 = vrot.slane %v64_v42, 2 }
  0x9b   :  { %v254_v6 = vrot.slane %v232_v52, %v1339_v16  ;;  %v1392_v8 = vcombine.low %v59_v45, %v62_v51  ;;  %v163_v9 = vrot.slane %v64_v42, 3  ;;  %v1394_v12 = vcombine.low %v129_v46, %v130_v55 }
  0x9c   :  { %v67_v58 = vpop.permute.xlu0 %66  ;;  %v70_v59 = vpop.permute.xlu1 %69  ;;  %v425_v15 = vcombine.low %v417_v47, %v424_v62  ;;  %v1397_v18 = vcombine.low %v161_v50, %v162_v57  ;;  %v270_v20 = vrot.slane %v262_v60, %v1339_v16  ;;  %v620_v21 = vrot.slane %v606_v56, %v1339_v16 }
  0x9d   :  { %v68_v4 = vrot.slane %v67_v58, 1  ;;  %v233_v5 = vcombine.low %v64_v42, %v67_v58  ;;  %v132_v11 = vrot.slane %v67_v58, 2  ;;  %v164_v13 = vrot.slane %v67_v58, 3 }
  0x9e   :  { %v436_v22 = vrot.slane %v1372_v33, %v1339_v16  ;;  %v71_v25 = vrot.slane %v70_v59, 1  ;;  %v133_v26 = vrot.slane %v70_v59, 2  ;;  %v165_v28 = vrot.slane %v70_v59, 3 }
  0x9f   :  { %v261_v14 = vrot.slane %v233_v5, %v1339_v16  ;;  %v429_v24 = vcombine.low %v65_v0, %v68_v4  ;;  %v1403_v29 = vcombine.low %v131_v1, %v132_v11  ;;  %v1405_v34 = vcombine.low %v163_v9, %v164_v13 }
  0xa0   :  { %v73_v19 = vpop.permute.xlu0 %72  ;;  %v76_v17 = vpop.permute.xlu1 %75  ;;  %v1408_v38 = vsel %vm981_vm0, %v425_v15, -inf  ;;  %v621_v42 = vcombine.low %v613_v63, %v620_v21  ;;  %v443_v43 = vrot.slane %v1382_v49, %v1339_v16  ;;  %v450_v45 = vrot.slane %v1392_v8, %v1339_v16 }
  0xa1   :  { %v74_v30 = vrot.slane %v73_v19, 1  ;;  %v279_v31 = vcombine.low %v70_v59, %v73_v19  ;;  %v263_v32 = vcombine.low %v254_v6, %v261_v14  ;;  %v134_v35 = vrot.slane %v73_v19, 2 }
  0xa2   :  { %v166_v36 = vrot.slane %v73_v19, 3  ;;  %v77_v46 = vrot.slane %v76_v17, 1  ;;  %v135_v47 = vrot.slane %v76_v17, 2  ;;  %v167_v50 = vrot.slane %v76_v17, 3 }
  0xa3   :  { %v277_v33 = vrot.slane %v263_v32, %v1339_v16  ;;  %v289_v52 = vrot.slane %v279_v31, %v1339_v16  ;;  %v475_v55 = vcombine.low %v71_v25, %v74_v30  ;;  %v1416_v58 = vcombine.low %v133_v26, %v134_v35 }
  0xa4   :  { %v79_v39 = vpop.permute.xlu0 %78  ;;  %v82_v41 = vpop.permute.xlu1 %81  ;;  %v1418_v59 = vcombine.low %v165_v28, %v166_v36  ;;  %v1423_v4 = vsel %vm981_vm0, %v621_v42, -inf  ;;  %v457_v5 = vrot.slane %v429_v24, %v1339_v16  ;;  %v1426_v11 = vcombine.low %v436_v22, %v443_v43 }
  0xa5   :  { %v280_v51 = vcombine.low %v76_v17, %v79_v39  ;;  %v80_v56 = vrot.slane %v79_v39, 1  ;;  %v278_v57 = vcombine.low %v270_v20, %v277_v33  ;;  %v136_v60 = vrot.slane %v79_v39, 2 }
  0xa6   :  { %v168_v62 = vrot.slane %v79_v39, 3  ;;  %v83_v6 = vrot.slane %v82_v41, 1  ;;  %v137_v8 = vrot.slane %v82_v41, 2  ;;  %v169_v14 = vrot.slane %v82_v41, 3 }
  0xa7   :  { %v296_v49 = vrot.slane %v280_v51, %v1339_v16  ;;  %v985_v63 = vsel %vm981_vm0, %v278_v57, -inf  ;;  %v476_v13 = vcombine.low %v77_v46, %v80_v56  ;;  %v672_v17 = vcombine.low %v135_v47, %v136_v60 }
  0xa8   :  { %v85_v0 = vpop.permute.xlu0 %84  ;;  %v88_v1 = vpop.permute.xlu1 %87  ;;  %986 = vmax.xlane.f32.xlu0 %v985_v63  ;;  %v1428_v20 = vcombine.low %v167_v50, %v168_v62  ;;  %v485_v25 = vrot.slane %v475_v55, %v1339_v16  ;;  %v681_v31 = vrot.slane %v1416_v58, %v1339_v16  ;;  %v1435_v22 = vcombine.low %v450_v45, %v457_v5 }
  0xa9   :  { %v86_v9 = vrot.slane %v85_v0, 1  ;;  %v138_v15 = vrot.slane %v85_v0, 2  ;;  %v281_v19 = vcombine.low %v82_v41, %v85_v0  ;;  %v170_v21 = vrot.slane %v85_v0, 3 }
  0xaa   :  { %v89_v26 = vrot.slane %v88_v1, 1  ;;  %v311_v24 = vcombine.low %v289_v52, %v296_v49  ;;  %v139_v35 = vrot.slane %v88_v1, 2  ;;  %v171_v42 = vrot.slane %v88_v1, 3 }
  0xab   :  { %v477_v32 = vcombine.low %v83_v6, %v86_v9  ;;  %v303_v41 = vrot.slane %v281_v19, %v1339_v16  ;;  %v673_v33 = vcombine.low %v137_v8, %v138_v15  ;;  %v1438_v46 = vcombine.low %v169_v14, %v170_v21 }
  0xac   :  { %v91_v28 = vpop.permute.xlu0 %90  ;;  %v1431_v30 = vpop.permute.xlu1 %93  ;;  %v492_v51 = vrot.slane %v476_v13, %v1339_v16  ;;  %v319_v56 = vrot.slane %v311_v24, %v1339_v16  ;;  %v688_v57 = vrot.slane %v672_v17, %v1339_v16  ;;  %v466_v58 = vrot.slane %v1426_v11, %v1339_v16 }
  0xad   :  { %v92_v36 = vrot.slane %v91_v28, 1  ;;  %v282_v39 = vcombine.low %v88_v1, %v91_v28  ;;  %v140_v43 = vrot.slane %v91_v28, 2  ;;  %v172_v47 = vrot.slane %v91_v28, 3 }
  0xae   :  { %v95_v60 = vrot.slane %v1431_v30, 1  ;;  %v141_v62 = vrot.slane %v1431_v30, 2  ;;  %v499_v63 = vrot.slane %v477_v32, %v1339_v16  ;;  %v507_v13 = vcombine.low %v485_v25, %v492_v51 }
  0xaf   :  { %v310_v50 = vrot.slane %v282_v39, %v1339_v16  ;;  %v478_v52 = vcombine.low %v89_v26, %v92_v36  ;;  %v674_v0 = vcombine.low %v139_v35, %v140_v43  ;;  %v1455_v8 = vcombine.low %v171_v42, %v172_v47 }
  0xb0   :  { %v1442_v55 = vpop.permute.xlu0 %96  ;;  %v100_v45 = vpop.permute.xlu1 %99  ;;  %v695_v14 = vrot.slane %v673_v33, %v1339_v16  ;;  %v1463_v26 = vcombine.low %v681_v31, %v688_v57  ;;  %v473_v28 = vrot.slane %v1435_v22, %v1339_v16  ;;  %v801_v11 = vcombine.low %v779_v48, %v786_v2 }
  0xb1   :  { %v98_v1 = vrot.slane %v1442_v55, 1  ;;  %v328_v5 = vcombine.low %v1431_v30, %v1442_v55  ;;  %v312_v6 = vcombine.low %v303_v41, %v310_v50  ;;  %v142_v9 = vrot.slane %v1442_v55, 2 }
  0xb2   :  { %v506_v21 = vrot.slane %v478_v52, %v1339_v16  ;;  %v101_v32 = vrot.slane %v100_v45, 1  ;;  %v143_v35 = vrot.slane %v100_v45, 2  ;;  %v175_v41 = vrot.slane %v100_v45, 3 }
  0xb3   :  { %v326_v17 = vrot.slane %v312_v6, %v1339_v16  ;;  %v338_v25 = vrot.slane %v328_v5, %v1339_v16  ;;  %v1469_v39 = vcombine.low %v95_v60, %v98_v1  ;;  %v1471_v42 = vcombine.low %v141_v62, %v142_v9 }
  0xb4   :  { %v103_v15 = vpop.permute.xlu0 %102  ;;  %v1459_v19 = vpop.permute.xlu1 %105  ;;  %v702_v31 = vrot.slane %v674_v0, %v1339_v16  ;;  %v508_v5 = vcombine.low %v499_v63, %v506_v21  ;;  %v515_v62 = vrot.slane %v507_v13, %v1339_v16  ;;  %v711_v3 = vrot.slane %v1463_v26, %v1339_v16 }
  0xb5   :  { %v329_v36 = vcombine.low %v100_v45, %v103_v15  ;;  %v327_v33 = vcombine.low %v319_v56, %v326_v17  ;;  %v104_v43 = vrot.slane %v103_v15, 1  ;;  %v144_v47 = vrot.slane %v103_v15, 2 }
  0xb6   :  { %v176_v50 = vrot.slane %v103_v15, 3  ;;  %v107_v60 = vrot.slane %v1459_v19, 1  ;;  %v145_v45 = vrot.slane %v1459_v19, 2  ;;  %v177_v0 = vrot.slane %v1459_v19, 3 }
  0xb7   :  { %v345_v22 = vrot.slane %v329_v36, %v1339_v16  ;;  %v988_v51 = vsel %vm981_vm0, %v327_v33, -inf  ;;  %v522_v9 = vrot.slane %v508_v5, %v1339_v16  ;;  %v525_v15 = vcombine.low %v101_v32, %v104_v43 }
  0xb8   :  { %v1476_v52 = vpop.permute.xlu0 %108  ;;  %v1478_v57 = vpop.permute.xlu1 %111  ;;  %989 = vmax.xlane.f32.xlu0 %v988_v51  ;;  %v1489_v63 = vcombine.low %v143_v35, %v144_v47  ;;  %v704_v21 = vcombine.low %v695_v14, %v702_v31  ;;  %v1492_v36 = vcombine.low %v175_v41, %v176_v50  ;;  %v474_v31 = vcombine.low %v466_v58, %v473_v28 }
  0xb9   :  { %v110_v56 = vrot.slane %v1476_v52, 1  ;;  %v146_v1 = vrot.slane %v1476_v52, 2  ;;  %v330_v6 = vcombine.low %v1459_v19, %v1476_v52  ;;  %v113_v17 = vrot.slane %v1478_v57, 1 }
  0xba   :  { %v523_v13 = vcombine.low %v515_v62, %v522_v9  ;;  %v360_v51 = vcombine.low %v338_v25, %v345_v22  ;;  %v178_v49 = vrot.slane %v1476_v52, 3  ;;  %v147_v41 = vrot.slane %v1478_v57, 2 }
  0xbb   :  { %v526_v24 = vcombine.low %v107_v60, %v110_v56  ;;  %v352_v14 = vrot.slane %v330_v6, %v1339_v16  ;;  %v1504_v35 = vcombine.low %v145_v45, %v146_v1  ;;  %v179_v25 = vrot.slane %v1478_v57, 3 }
  0xbc   :  { %v1494_v33 = vpop.permute.xlu0 %114  ;;  %995 = vmax.xlane.f32.xlu0 %v1408_v38  ;;  %v718_v47 = vrot.slane %v704_v21, %v1339_v16  ;;  %v1000_v38 = vsel %vm981_vm0, %v523_v13, -inf  ;;  %v368_v22 = vrot.slane %v360_v51, %v1339_v16  ;;  %v800_v60 = vrot.slane %v1362_v10, %v1339_v16 }
  0xbd   :  { %v116_v5 = vrot.slane %v1494_v33, 1  ;;  %v331_v32 = vcombine.low %v1478_v57, %v1494_v33  ;;  %v148_v50 = vrot.slane %v1494_v33, 2  ;;  %v541_v45 = vrot.slane %v525_v15, %v1339_v16 }
  0xbe   :  { %v548_v56 = vrot.slane %v526_v24, %v1339_v16  ;;  %v802_v58 = vcombine.low %v793_v23, %v800_v60  ;;  %v534_v10 = vrot.slane %v1469_v39, %v1339_v16  ;;  %v884_v28 = vrot.slane %v1428_v20, %v1339_v16 }
  0xbf   :  { %v359_v26 = vrot.slane %v331_v32, %v1339_v16  ;;  %v527_v43 = vcombine.low %v113_v17, %v116_v5  ;;  %v719_v1 = vcombine.low %v711_v3, %v718_v47  ;;  %v877_v40 = vrot.slane %v1418_v59, %v1339_v16 }
  0xc0   :  { %1001 = vmax.xlane.f32.xlu0 %v1000_v38  ;;  %v816_v27 = vrot.slane %v802_v58, %v1339_v16  ;;  %v556_v48 = vcombine.low %v534_v10, %v541_v45  ;;  %v891_v61 = vrot.slane %v1438_v46, %v1339_v16  ;;  %v898_v2 = vrot.slane %v1455_v8, %v1339_v16 }
  0xc1   :  { %v361_v57 = vcombine.low %v352_v14, %v359_v26  ;;  %v555_v62 = vrot.slane %v527_v43, %v1339_v16  ;;  %v180_v23 = vrot.slane %v1494_v33, 3  ;;  %v723_v39 = vcombine.low %v147_v41, %v148_v50 }
  0xc2   :  { %v639_v3 = vrot.slane %v1384_v53, %v1339_v16  ;;  %v809_v59 = vrot.slane %v801_v11, %v1339_v16  ;;  %v899_v15 = vcombine.low %v877_v40, %v884_v28  ;;  %v900_v17 = vcombine.low %v891_v61, %v898_v2 }
  0xc3   :  { %v375_v24 = vrot.slane %v361_v57, %v1339_v16  ;;  %v557_v6 = vcombine.low %v548_v56, %v555_v62  ;;  %v632_v8 = vrot.slane %v1375_v37, %v1339_v16  ;;  %v646_v21 = vrot.slane %v1394_v12, %v1339_v16 }
  0xc4   :  { %1007 = vmax.xlane.f32.xlu0 %v1423_v4  ;;  %v653_v4 = vrot.slane %v1403_v29, %v1339_v16  ;;  %v1012_v53 = vsel %vm981_vm0, %v719_v1, -inf  ;;  %v817_v33 = vcombine.low %v809_v59, %v816_v27  ;;  %v564_v13 = vrot.slane %v556_v48, %v1339_v16 }
  0xc5   :  { %v376_v20 = vcombine.low %v368_v22, %v375_v24  ;;  %v571_v9 = vrot.slane %v557_v6, %v1339_v16  ;;  %v914_v51 = vrot.slane %v900_v17, %v1339_v16  ;;  %v997_v5 = vsel %vm981_vm0, %v474_v31, -inf }
  0xc6   :  { %v654_v32 = vcombine.low %v632_v8, %v639_v3  ;;  %v655_v14 = vcombine.low %v646_v21, %v653_v4  ;;  %v737_v37 = vrot.slane %v1489_v63, %v1339_v16  ;;  %v907_v41 = vrot.slane %v899_v15, %v1339_v16 }
  0xc7   :  { %v991_v46 = vsel %vm981_vm0, %v376_v20, -inf  ;;  %v572_v12 = vcombine.low %v564_v13, %v571_v9  ;;  %v744_v29 = vrot.slane %v1504_v35, %v1339_v16  ;;  %v751_v26 = vrot.slane %v723_v39, %v1339_v16 }
  0xc8   :  { %992 = vmax.xlane.f32.xlu1 %v991_v46  ;;  %1013 = vmax.xlane.f32.xlu0 %v1012_v53  ;;  %v919_v43 = vcombine.low %v179_v25, %v180_v23  ;;  %v669_v47 = vrot.slane %v655_v14, %v1339_v16  ;;  %v730_v50 = vrot.slane %v1471_v42, %v1339_v16  ;;  %v1018_v38 = vsel %vm981_vm0, %v817_v33, -inf }
  0xc9   :  { %v849_v31 = vrot.slane %v1405_v34, %v1339_v16  ;;  %v918_v63 = vcombine.low %v177_v0, %v178_v49  ;;  %v915_v35 = vcombine.low %v907_v41, %v914_v51  ;;  %v753_v22 = vcombine.low %v744_v29, %v751_v26 }
  0xca   :  { %v662_v25 = vrot.slane %v654_v32, %v1339_v16  ;;  %v752_v60 = vcombine.low %v730_v50, %v737_v37  ;;  %v835_v42 = vrot.slane %v1386_v54, %v1339_v16  ;;  %v842_v34 = vrot.slane %v1397_v18, %v1339_v16 }
  0xcb   :  { %v1644_v52 = vrot.slane %v1442_v55, 3  ;;  %v1645_v19 = vrot.slane %v1431_v30, 3  ;;  %v1003_v0 = vsel %vm981_vm0, %v572_v12, -inf  ;;  %v828_v57 = vrot.slane %v1379_v44, %v1339_v16 }
  0xcc   :  { %998 = vmax.xlane.f32.xlu1 %v997_v5  ;;  %1019 = vmax.xlane.f32.xlu0 %v1018_v38  ;;  %v670_v45 = vcombine.low %v662_v25, %v669_v47  ;;  %v767_v56 = vrot.slane %v753_v22, %v1339_v16  ;;  %v851_v62 = vcombine.low %v842_v34, %v849_v31  ;;  %v1024_v54 = vsel %vm981_vm0, %v915_v35, -inf }
  0xcd   :  { %v916_v49 = vcombine.low %v1645_v19, %v1644_v52  ;;  %v947_v11 = vrot.slane %v919_v43, %v1339_v16  ;;  %v760_v18 = vrot.slane %v752_v60, %v1339_v16  ;;  %v850_v55 = vcombine.low %v828_v57, %v835_v42 }
  0xce   :  { %v933_v30 = vrot.slane %v1492_v36, %v1339_v16  ;;  %v940_v58 = vrot.slane %v918_v63, %v1339_v16  ;;  %v1009_v10 = vsel %vm981_vm0, %v670_v45, -inf  ;;  %v865_v24 = vrot.slane %v851_v62, %v1339_v16 }
  0xcf   :  { %v926_v44 = vrot.slane %v916_v49, %v1339_v16  ;;  %v768_v28 = vcombine.low %v760_v18, %v767_v56  ;;  %v858_v6 = vrot.slane %v850_v55, %v1339_v16  ;;  %v1646_v59 = vlaneseq }
  0xd0   :  { %1004 = vmax.xlane.f32.xlu1 %v1003_v0  ;;  %1025 = vmax.xlane.f32.xlu0 %v1024_v54  ;;  %v949_v1 = vcombine.low %v940_v58, %v947_v11 }
  0xd1   :  { %v948_v40 = vcombine.low %v926_v44, %v933_v30  ;;  %v1015_v27 = vsel %vm981_vm0, %v768_v28, -inf  ;;  %v866_v48 = vcombine.low %v858_v6, %v865_v24  ;;  %v1604_v9 = vand.u32 127, %v1646_v59 }
  0xd2   :  { %v963_v61 = vrot.slane %v949_v1, %v1339_v16 }
  0xd3   :  { %v956_v36 = vrot.slane %v948_v40, %v1339_v16  ;;  %v1021_v2 = vsel %vm981_vm0, %v866_v48, -inf  ;;  %v1052_v15 = vadd.s32 4294967288, %v1604_v9  ;;  %v1059_v17 = vadd.s32 4294967280, %v1604_v9 }
  0xd4   :  { %1010 = vmax.xlane.f32.xlu1 %v1009_v10  ;;  %v1066_v16 = vadd.s32 4294967272, %v1604_v9  ;;  %v1050_v4 = vsub.s32 %v1604_v9, %v1333_v7  ;;  %v1073_v33 = vadd.s32 4294967264, %v1604_v9  ;;  %v1080_v32 = vadd.s32 4294967256, %v1604_v9 }
  0xd5   :  { %v964_v23 = vcombine.low %v956_v36, %v963_v61  ;;  %v1055_v8 = vsub.s32 %v1052_v15, %v1333_v7  ;;  %v1062_v21 = vsub.s32 %v1059_v17, %v1333_v7  ;;  %v1087_v41 = vadd.s32 4294967248, %v1604_v9 }
  0xd6   :  { %v1069_v5 = vsub.s32 %v1066_v16, %v1333_v7  ;;  %v1076_v12 = vsub.s32 %v1073_v33, %v1333_v7  ;;  %v1083_v47 = vsub.s32 %v1080_v32, %v1333_v7  ;;  %v1094_v50 = vadd.s32 4294967240, %v1604_v9 }
  0xd7   :  { %v1027_v39 = vsel %vm981_vm0, %v964_v23, -inf  ;;  %v1090_v22 = vsub.s32 %v1087_v41, %v1333_v7  ;;  %v1101_v25 = vadd.s32 4294967232, %v1604_v9  ;;  %v1108_v52 = vadd.s32 4294967224, %v1604_v9 }
  0xd8   :  { %1016 = vmax.xlane.f32.xlu1 %v1015_v27  ;;  %v1097_v34 = vsub.s32 %v1094_v50, %v1333_v7  ;;  %v1115_v45 = vadd.s32 4294967216, %v1604_v9  ;;  %v1122_v18 = vadd.s32 4294967208, %v1604_v9  ;;  %v1129_v10 = vadd.s32 4294967200, %v1604_v9 }
  0xd9   :  { %v1104_v57 = vsub.s32 %v1101_v25, %v1333_v7  ;;  %v1111_v54 = vsub.s32 %v1108_v52, %v1333_v7  ;;  %v1136_v6 = vadd.s32 4294967192, %v1604_v9 }
  0xda   :  { %v1118_v44 = vsub.s32 %v1115_v45, %v1333_v7  ;;  %v1125_v1 = vsub.s32 %v1122_v18, %v1333_v7  ;;  %v1132_v36 = vsub.s32 %v1129_v10, %v1333_v7 }
  0xdc   :  { %1022 = vmax.xlane.f32.xlu1 %v1021_v2  ;;  %v1143_v2 = vadd.s32 4294967184, %v1604_v9 }
  0xe0   :  { %1028 = vmax.xlane.f32.xlu1 %v1027_v39 }
 0x121   :  { %v984_v53 = vpop.xlane.xlu1 %983 }
 0x122   :  { %v1051_v37 = vrot.slane %v984_v53, %v1050_v4 }
 0x131   :  { %v987_v20 = vpop.xlane.xlu0 %986 }
 0x132   :  { %v1056_v13 = vrot.slane %v987_v20, %v1055_v8  ;;  %v1139_v20 = vsub.s32 %v1136_v6, %v1333_v7 }
 0x134   :  { %v1058_v26 = vsel %vm1057_vm1, %v1056_v13, %v1051_v37 }
 0x141   :  { %v990_v3 = vpop.xlane.xlu0 %989 }
 0x142   :  { %v1063_v14 = vrot.slane %v990_v3, %v1062_v21  ;;  %v1150_v3 = vadd.s32 4294967176, %v1604_v9 }
 0x144   :  { %v1065_v31 = vsel %vm1064_vm2, %v1063_v14, %v1058_v26  ;;  %v1153_v4 = vsub.s32 %v1150_v3, %v1333_v7 }
 0x145   :  { %v996_v46 = vpop.xlane.xlu0 %995 }
 0x146   :  { %v1077_v35 = vrot.slane %v996_v46, %v1076_v12  ;;  %v1146_v46 = vsub.s32 %v1143_v2, %v1333_v7 }
 0x149   :  { %v1002_v51 = vpop.xlane.xlu0 %1001 }
 0x14a   :  { %v1091_v0 = vrot.slane %v1002_v51, %v1090_v22 }
 0x14d   :  { %v1008_v63 = vpop.xlane.xlu0 %1007 }
 0x14e   :  { %v1105_v58 = vrot.slane %v1008_v63, %v1104_v57 }
 0x151   :  { %v993_v29 = vpop.xlane.xlu1 %992  ;;  %v1014_v62 = vpop.xlane.xlu0 %1013 }
 0x152   :  { %v1070_v43 = vrot.slane %v993_v29, %v1069_v5  ;;  %v1119_v61 = vrot.slane %v1014_v62, %v1118_v44 }
 0x154   :  { %v1072_v38 = vsel %vm1071_vm3, %v1070_v43, %v1065_v31 }
 0x155   :  { %v999_v60 = vpop.xlane.xlu1 %998  ;;  %v1079_v19 = vsel %vm1078_vm4, %v1077_v35, %v1072_v38  ;;  %v1020_v27 = vpop.xlane.xlu0 %1019 }
 0x156   :  { %v1084_v42 = vrot.slane %v999_v60, %v1083_v47  ;;  %v1133_v17 = vrot.slane %v1020_v27, %v1132_v36 }
 0x158   :  { %v1086_v49 = vsel %vm1085_vm5, %v1084_v42, %v1079_v19 }
 0x159   :  { %v1005_v56 = vpop.xlane.xlu1 %1004  ;;  %v1093_v55 = vsel %vm1092_vm6, %v1091_v0, %v1086_v49  ;;  %v1026_v16 = vpop.xlane.xlu0 %1025 }
 0x15a   :  { %v1098_v11 = vrot.slane %v1005_v56, %v1097_v34  ;;  %v1147_v13 = vrot.slane %v1026_v16, %v1146_v46 }
 0x15c   :  { %v1100_v30 = vsel %vm1099_vm7, %v1098_v11, %v1093_v55 }
 0x15d   :  { %v1011_v28 = vpop.xlane.xlu1 %1010  ;;  %v1107_v40 = vsel %vm1106_vm8, %v1105_v58, %v1100_v30 }
 0x15e   :  { %v1112_v24 = vrot.slane %v1011_v28, %v1111_v54 }
 0x160   :  { %v1114_v48 = vsel %vm1113_vm9, %v1112_v24, %v1107_v40 }
 0x161   :  { %v1017_v23 = vpop.xlane.xlu1 %1016  ;;  %v1121_v59 = vsel %vm1120_vm10, %v1119_v61, %v1114_v48 }
 0x162   :  { %v1126_v39 = vrot.slane %v1017_v23, %v1125_v1 }
 0x164   :  { %v1128_v15 = vsel %vm1127_vm11, %v1126_v39, %v1121_v59 }
 0x165   :  { %v1023_v8 = vpop.xlane.xlu1 %1022  ;;  %v1135_v53 = vsel %vm1134_vm12, %v1133_v17, %v1128_v15 }
 0x166   :  { %v1140_v21 = vrot.slane %v1023_v8, %v1139_v20 }
 0x168   :  { %v1142_v33 = vsel %vm1141_vm13, %v1140_v21, %v1135_v53 }
 0x169   :  { %v1029_v51 = vpop.xlane.xlu1 %1028  ;;  %v1149_v5 = vsel %vm1148_vm14, %v1147_v13, %v1142_v33 }
 0x16a   :  { %v1154_v9 = vrot.slane %v1029_v51, %v1153_v4 }
 0x16c   :  { %v1156_v32 = vsel %vm1155_vm15, %v1154_v9, %v1149_v5 }
 0x16d   :  { %1158 = vst [vmem:[#allocation5] sm:$0x1] %v1156_v32 }
 0x16e   :  { %1239 = shalt.err (!%p1236_p9)
}
 0x16f   :  { %1168 = dma.vmem_to_hbm [thread:$0]  %s1166_s13, 16, %s1642_s1, [#allocation4]  }
 0x170   :  { %1250 = dma.done.wait [#allocation4], 16  }
 0x171   :  { %1251 = vsyncadd [#allocation4], 4294967280 }
 0x172   :  { %1172 = vsyncpa [#allocation3], 1 }
 0x173   :  { %1173 = vsyncpa [#allocation4], 1 }

</bundles_post_ra>
